<compile_context>
chip_gen: v7x
topology: tpu7x:2x2x1
jax: 0.10.0
libtpu: 0.0.40
codegen_flags: <defaults>
</compile_context>

<pallas_src>
import math

import jax
import jax.numpy as jnp
from jax.experimental import pallas as pl
from jax.experimental.pallas import tpu as pltpu


def _flat_2d(shape):
    """Flatten to a wide, contiguous [rows, cols] slab.

    Prefer 128-lane-dense rows when the element count allows it; otherwise
    merge all trailing dims so the contiguous copy stays wide.
    """
    total = math.prod(shape)
    if total % 128 == 0:
        return total // 128, 128
    lead = shape[0]
    return lead, total // lead


def _make_hbm_copy_kernel(bounds):
    """Kernel: chunked HBM->HBM DMA copy of a [rows, cols] slab.

    `bounds` is a static Python tuple of (row_start, row_size) chunks. All
    chunk copies are started first (kept in flight), then waited on.
    """

    def kernel(x_hbm, o_hbm, sems):
        copies = []
        for k, (start, size) in enumerate(bounds):
            cp = pltpu.make_async_copy(
                x_hbm.at[pl.ds(start, size), :],
                o_hbm.at[pl.ds(start, size), :],
                sems.at[k],
            )
            cp.start()
            copies.append(cp)
        for cp in copies:
            cp.wait()

    return kernel


def _pallas_materialize_2d(x2d, n_dma=4):
    """Materialise a copy of a 2-D slab via direct HBM->HBM chunked DMA."""
    rows, cols = x2d.shape

    # Split the row axis into ~n_dma chunks; round chunk size up to a sublane
    # multiple when the tensor is big enough, keep the ragged tail explicit.
    n_target = max(1, min(n_dma, rows))
    base = -(-rows // n_target)          # ceil-div
    if rows >= 8:
        base = -(-base // 8) * 8         # round up to multiple of 8 rows
    bounds = []
    s = 0
    while s < rows:
        sz = min(base, rows - s)
        bounds.append((s, sz))
        s += sz

    kernel = _make_hbm_copy_kernel(tuple(bounds))

    return pl.pallas_call(
        kernel,
        out_shape=jax.ShapeDtypeStruct((rows, cols), x2d.dtype),
        in_specs=[pl.BlockSpec(memory_space=pl.ANY)],     # raw HBM ref, no auto-DMA
        out_specs=pl.BlockSpec(memory_space=pl.ANY),      # write HBM directly
        scratch_shapes=[pltpu.SemaphoreType.DMA((len(bounds),))],
        compiler_params=pltpu.CompilerParams(has_side_effects=True),
    )(x2d)


def as2d(x, z_as_channel=True, materialize=False):
    """Pallas/JAX implementation of As2D.forward.

    By default this is a free, metadata-only reshape (no bytes moved).  Set
    materialize=True to force a physical copy via the Pallas HBM->HBM DMA
    kernel (useful when a fresh buffer is required).
    """
    if x.ndim == 5:
        b, c, z, h, w = x.shape
        if not z_as_channel:
            assert z == 1
        out_shape = (b, c * z, h, w)
    elif x.ndim == 4:
        # PyTorch returns the input unchanged; never copy here.
        return x
    elif x.ndim == 2:
        b, c = x.shape
        out_shape = (b, c, 1, 1)
    else:
        raise ValueError(f"As2D: unsupported rank {x.ndim}")

    if not materialize:
        # Contiguous-merge reshape: metadata-only, zero HBM traffic.
        return x.reshape(out_shape)

    rows, cols = _flat_2d(x.shape)
    flat = x.reshape(rows, cols)           # contiguous merge: layout no-op
    out2d = _pallas_materialize_2d(flat)
    return out2d.reshape(out_shape)


if __name__ == "__main__":
    key = jax.random.PRNGKey(0)
    k5, k5r, k4, k2 = jax.random.split(key, 4)

    # 5-D path, lane-dense element count: [b, c, z, h, w] -> [b, c*z, h, w]
    x5 = jax.random.normal(k5, (2, 3, 2, 16, 16), dtype=jnp.float32)
    ref5 = x5.reshape(2, 6, 16, 16)
    y5 = jax.block_until_ready(as2d(x5))                      # free reshape path
    y5m = jax.block_until_ready(as2d(x5, materialize=True))   # Pallas DMA path
    assert y5.shape == (2, 6, 16, 16) and jnp.array_equal(y5, ref5)
    assert y5m.shape == (2, 6, 16, 16) and jnp.array_equal(y5m, ref5)

    # 5-D ragged element count (not a multiple of 128), z_as_channel=False (z==1)
    x5r = jax.random.normal(k5r, (2, 3, 1, 5, 7), dtype=jnp.float32)
    y5r = jax.block_until_ready(as2d(x5r, z_as_channel=False, materialize=True))
    assert y5r.shape == (2, 3, 5, 7)
    assert jnp.array_equal(y5r, x5r.reshape(2, 3, 5, 7))

    # 4-D path: identity (no copy, matches PyTorch returning the input)
    x4 = jax.random.normal(k4, (2, 4, 16, 16), dtype=jnp.float32)
    y4 = jax.block_until_ready(as2d(x4, materialize=True))
    assert y4.shape == x4.shape and jnp.array_equal(y4, x4)

    # 2-D path: [b, c] -> [b, c, 1, 1]
    x2 = jax.random.normal(k2, (2, 8), dtype=jnp.float32)
    y2 = jax.block_until_ready(as2d(x2))
    y2m = jax.block_until_ready(as2d(x2, materialize=True))
    assert y2.shape == (2, 8, 1, 1) and jnp.array_equal(y2, x2.reshape(2, 8, 1, 1))
    assert y2m.shape == (2, 8, 1, 1) and jnp.array_equal(y2m, x2.reshape(2, 8, 1, 1))

    print("KERNEL_OK")
</pallas_src>

<mosaic_0001>
module attributes {stable_mosaic.version = 11 : i64} {
  func.func @kernel(%arg0: memref<24x128xf32, #tpu.memory_space<any>>, %arg1: memref<24x128xf32, #tpu.memory_space<any>>, %arg2: memref<3x!tpu.dma_semaphore, #tpu.memory_space<semaphore_mem>>) attributes {dimension_semantics = [], scalar_prefetch = 0 : i64, scratch_operands = 1 : i64, tpu.core_type = #tpu.core_type<tc>} {
    %c0_i32 = arith.constant 0 : i32
    %c0_i32_0 = arith.constant 0 : i32
    %c0_i32_1 = arith.constant 0 : i32
    %0 = tpu.memref_slice %arg0[%c0_i32_0, %c0_i32_1] : memref<24x128xf32, #tpu.memory_space<any>> -> memref<8x128xf32, #tpu.memory_space<any>>
    %c0_i32_2 = arith.constant 0 : i32
    %c0_i32_3 = arith.constant 0 : i32
    %1 = tpu.memref_slice %arg1[%c0_i32_2, %c0_i32_3] : memref<24x128xf32, #tpu.memory_space<any>> -> memref<8x128xf32, #tpu.memory_space<any>>
    %2 = tpu.memref_slice %arg2[%c0_i32] : memref<3x!tpu.dma_semaphore, #tpu.memory_space<semaphore_mem>> -> memref<1x!tpu.dma_semaphore, #tpu.memory_space<semaphore_mem>>
    %3 = tpu.memref_squeeze %2 : memref<1x!tpu.dma_semaphore, #tpu.memory_space<semaphore_mem>> -> memref<!tpu.dma_semaphore, #tpu.memory_space<semaphore_mem>>
    tpu.enqueue_dma source(%0 : memref<8x128xf32, #tpu.memory_space<any>>) target(%1 : memref<8x128xf32, #tpu.memory_space<any>>) target_semaphore(%3 : memref<!tpu.dma_semaphore, #tpu.memory_space<semaphore_mem>>)
    %c1_i32 = arith.constant 1 : i32
    %c8_i32 = arith.constant 8 : i32
    %c0_i32_4 = arith.constant 0 : i32
    %4 = tpu.memref_slice %arg0[%c8_i32, %c0_i32_4] : memref<24x128xf32, #tpu.memory_space<any>> -> memref<8x128xf32, #tpu.memory_space<any>>
    %c8_i32_5 = arith.constant 8 : i32
    %c0_i32_6 = arith.constant 0 : i32
    %5 = tpu.memref_slice %arg1[%c8_i32_5, %c0_i32_6] : memref<24x128xf32, #tpu.memory_space<any>> -> memref<8x128xf32, #tpu.memory_space<any>>
    %6 = tpu.memref_slice %arg2[%c1_i32] : memref<3x!tpu.dma_semaphore, #tpu.memory_space<semaphore_mem>> -> memref<1x!tpu.dma_semaphore, #tpu.memory_space<semaphore_mem>>
    %7 = tpu.memref_squeeze %6 : memref<1x!tpu.dma_semaphore, #tpu.memory_space<semaphore_mem>> -> memref<!tpu.dma_semaphore, #tpu.memory_space<semaphore_mem>>
    tpu.enqueue_dma source(%4 : memref<8x128xf32, #tpu.memory_space<any>>) target(%5 : memref<8x128xf32, #tpu.memory_space<any>>) target_semaphore(%7 : memref<!tpu.dma_semaphore, #tpu.memory_space<semaphore_mem>>)
    %c2_i32 = arith.constant 2 : i32
    %c16_i32 = arith.constant 16 : i32
    %c0_i32_7 = arith.constant 0 : i32
    %8 = tpu.memref_slice %arg0[%c16_i32, %c0_i32_7] : memref<24x128xf32, #tpu.memory_space<any>> -> memref<8x128xf32, #tpu.memory_space<any>>
    %c16_i32_8 = arith.constant 16 : i32
    %c0_i32_9 = arith.constant 0 : i32
    %9 = tpu.memref_slice %arg1[%c16_i32_8, %c0_i32_9] : memref<24x128xf32, #tpu.memory_space<any>> -> memref<8x128xf32, #tpu.memory_space<any>>
    %10 = tpu.memref_slice %arg2[%c2_i32] : memref<3x!tpu.dma_semaphore, #tpu.memory_space<semaphore_mem>> -> memref<1x!tpu.dma_semaphore, #tpu.memory_space<semaphore_mem>>
    %11 = tpu.memref_squeeze %10 : memref<1x!tpu.dma_semaphore, #tpu.memory_space<semaphore_mem>> -> memref<!tpu.dma_semaphore, #tpu.memory_space<semaphore_mem>>
    tpu.enqueue_dma source(%8 : memref<8x128xf32, #tpu.memory_space<any>>) target(%9 : memref<8x128xf32, #tpu.memory_space<any>>) target_semaphore(%11 : memref<!tpu.dma_semaphore, #tpu.memory_space<semaphore_mem>>)
    %c0_i32_10 = arith.constant 0 : i32
    %c0_i32_11 = arith.constant 0 : i32
    %c0_i32_12 = arith.constant 0 : i32
    %12 = tpu.memref_slice %arg0[%c0_i32_11, %c0_i32_12] : memref<24x128xf32, #tpu.memory_space<any>> -> memref<8x128xf32, #tpu.memory_space<any>>
    %c0_i32_13 = arith.constant 0 : i32
    %c0_i32_14 = arith.constant 0 : i32
    %13 = tpu.memref_slice %arg1[%c0_i32_13, %c0_i32_14] : memref<24x128xf32, #tpu.memory_space<any>> -> memref<8x128xf32, #tpu.memory_space<any>>
    %14 = tpu.memref_slice %arg2[%c0_i32_10] : memref<3x!tpu.dma_semaphore, #tpu.memory_space<semaphore_mem>> -> memref<1x!tpu.dma_semaphore, #tpu.memory_space<semaphore_mem>>
    %15 = tpu.memref_squeeze %14 : memref<1x!tpu.dma_semaphore, #tpu.memory_space<semaphore_mem>> -> memref<!tpu.dma_semaphore, #tpu.memory_space<semaphore_mem>>
    tpu.wait_dma2 semaphore(%15 : memref<!tpu.dma_semaphore, #tpu.memory_space<semaphore_mem>>) src(%12 : memref<8x128xf32, #tpu.memory_space<any>>) dst(%13 : memref<8x128xf32, #tpu.memory_space<any>>)
    %c1_i32_15 = arith.constant 1 : i32
    %c8_i32_16 = arith.constant 8 : i32
    %c0_i32_17 = arith.constant 0 : i32
    %16 = tpu.memref_slice %arg0[%c8_i32_16, %c0_i32_17] : memref<24x128xf32, #tpu.memory_space<any>> -> memref<8x128xf32, #tpu.memory_space<any>>
    %c8_i32_18 = arith.constant 8 : i32
    %c0_i32_19 = arith.constant 0 : i32
    %17 = tpu.memref_slice %arg1[%c8_i32_18, %c0_i32_19] : memref<24x128xf32, #tpu.memory_space<any>> -> memref<8x128xf32, #tpu.memory_space<any>>
    %18 = tpu.memref_slice %arg2[%c1_i32_15] : memref<3x!tpu.dma_semaphore, #tpu.memory_space<semaphore_mem>> -> memref<1x!tpu.dma_semaphore, #tpu.memory_space<semaphore_mem>>
    %19 = tpu.memref_squeeze %18 : memref<1x!tpu.dma_semaphore, #tpu.memory_space<semaphore_mem>> -> memref<!tpu.dma_semaphore, #tpu.memory_space<semaphore_mem>>
    tpu.wait_dma2 semaphore(%19 : memref<!tpu.dma_semaphore, #tpu.memory_space<semaphore_mem>>) src(%16 : memref<8x128xf32, #tpu.memory_space<any>>) dst(%17 : memref<8x128xf32, #tpu.memory_space<any>>)
    %c2_i32_20 = arith.constant 2 : i32
    %c16_i32_21 = arith.constant 16 : i32
    %c0_i32_22 = arith.constant 0 : i32
    %20 = tpu.memref_slice %arg0[%c16_i32_21, %c0_i32_22] : memref<24x128xf32, #tpu.memory_space<any>> -> memref<8x128xf32, #tpu.memory_space<any>>
    %c16_i32_23 = arith.constant 16 : i32
    %c0_i32_24 = arith.constant 0 : i32
    %21 = tpu.memref_slice %arg1[%c16_i32_23, %c0_i32_24] : memref<24x128xf32, #tpu.memory_space<any>> -> memref<8x128xf32, #tpu.memory_space<any>>
    %22 = tpu.memref_slice %arg2[%c2_i32_20] : memref<3x!tpu.dma_semaphore, #tpu.memory_space<semaphore_mem>> -> memref<1x!tpu.dma_semaphore, #tpu.memory_space<semaphore_mem>>
    %23 = tpu.memref_squeeze %22 : memref<1x!tpu.dma_semaphore, #tpu.memory_space<semaphore_mem>> -> memref<!tpu.dma_semaphore, #tpu.memory_space<semaphore_mem>>
    tpu.wait_dma2 semaphore(%23 : memref<!tpu.dma_semaphore, #tpu.memory_space<semaphore_mem>>) src(%20 : memref<8x128xf32, #tpu.memory_space<any>>) dst(%21 : memref<8x128xf32, #tpu.memory_space<any>>)
    return
  }
}

</mosaic_0001>

<bundles_post_ra>
// kernel: tpu_custom_call.1
= control target key start
LH: loop header
LB: loop body
LE: loop exit
PB: predicated region body
PF: predicated region fallthrough
CT: control target
= control target key end

     0   :  { %s94_s9 = smov [#allocation2]   ;;  %s95_s10 = smov [#allocation3]   ;;  %s129_s0 = inlined_call_operand.hbm [shape: f32[24,128], index: 0, kind: input, shape index: {}]   ;;  %s130_s1 = inlined_call_operand.hbm [shape: f32[24,128], index: 1, kind: output, shape index: {}]  }
   0x1   :  { %s19_s8 = scalar_lea.hbm %s129_s0, 128  ;;  %s96_s11 = smov 0  }
   0x2   :  { %18 = dma.general %s129_s0, 128, %s130_s1, %s94_s9, %s95_s10, [#allocation4], %s96_s11, 0  }
   0x3   :  { %s20_s18 = scalar_lea.hbm %s130_s1, 128  ;;  %s35_s21 = scalar_lea.hbm %s129_s0, 256 }
   0x4   :  { %s36_s24 = scalar_lea.hbm %s130_s1, 256  ;;  %s97_s25 = smov [#allocation2 + $0x1]  }
   0x5   :  { %s98_s26 = smov [#allocation5]   ;;  %s99_s27 = smov [#allocation2 + $0x2]  }
   0x6   :  { %34 = dma.general %s19_s8, 128, %s20_s18, %s97_s25, %s98_s26, [#allocation6], %s96_s11, 0  }
   0x7   :  { %s100_s28 = smov [#allocation7]  }
   0x8   :  { %50 = dma.general %s35_s21, 128, %s36_s24, %s99_s27, %s100_s28, [#allocation8], %s96_s11, 0  }
   0x9   :  { %88 = dma.done.wait [#allocation2], 128 }
   0xa   :  { %89 = vsyncadd [#allocation2], 4294967168 }
   0xb   :  { %90 = dma.done.wait [#allocation2 + $0x1], 128 }
   0xc   :  { %91 = vsyncadd [#allocation2 + $0x1], 4294967168 }
   0xd   :  { %92 = dma.done.wait [#allocation2 + $0x2], 128 }
   0xe   :  { %93 = vsyncadd [#allocation2 + $0x2], 4294967168 }
   0xf   :  { %58 = vsyncmov [#allocation2] }
  0x12   :  { %s59_s29 = vpop.sfrf %58 }
  0x13   :  { %p78_p0 = scmp.ne.s32.totalorder %s59_s29, 0 }
  0x15   :  { %63 = shalt.err (%p78_p0)  }
  0x16   :  { %65 = vsyncmov [#allocation2 + $0x1] }
  0x19   :  { %s66_s0 = vpop.sfrf %65 }
  0x1a   :  { %p79_p1 = scmp.ne.s32.totalorder %s66_s0, 0 }
  0x1c   :  { %70 = shalt.err (%p79_p1)  }
  0x1d   :  { %72 = vsyncmov [#allocation2 + $0x2] }
  0x20   :  { %s73_s1 = vpop.sfrf %72 }
  0x21   :  { %p80_p2 = scmp.ne.s32.totalorder %s73_s1, 0 }
  0x23   :  { %77 = shalt.err (%p80_p2)  }

</bundles_post_ra>
